<compile_context>
chip_gen: v7x
topology: tpu7x:2x2x1
jax: 0.10.0
libtpu: 0.0.40
codegen_flags: <defaults>
</compile_context>

<pallas_src>
import functools

import jax
import jax.numpy as jnp
from jax.experimental import pallas as pl
from jax.experimental.pallas import tpu as pltpu


_RESIDENT_BYTES_DEFAULT = 1 << 20   # groups at/below this stay resident (one block)
_MAX_TILE_DEFAULT = 16384           # cap on per-group lane tile (bounds temps/unroll)


# ---------------------------------------------------------------------------
# static helpers
# ---------------------------------------------------------------------------
def _cdiv(a, b):
    return -(-a // b)


def _round_up(a, m):
    return _cdiv(a, m) * m


def _pack_factor(batch, flat_len):
    """Sublane packing factor S: rows = B*S >= 8 if possible, with S | flat_len."""
    if batch >= 8 or flat_len <= 1:
        return 1
    s = 1
    while batch * s < 8:
        s *= 2
    while s > 1 and flat_len % s != 0:
        s //= 2
    return s


def _const_map(i):
    return (0, 0)


def _clamped_map(nt):
    last = nt - 1

    def index_map(i):
        return (0, jnp.minimum(i, last))

    return index_map


def _vmem_caps():
    """(tiling budget bytes, scoped vmem_limit_bytes), generation aware."""
    try:
        cap = int(pltpu.get_tpu_info().vmem_capacity_bytes)
    except Exception:   # older jax / no query available -> conservative 64 MiB
        cap = 64 << 20
    cap = min(max(cap, 32 << 20), 128 << 20)
    return int(cap * 0.70), int(cap * 0.85)


# ---------------------------------------------------------------------------
# in-kernel math
# ---------------------------------------------------------------------------
def _group_vals(kind, refs):
    """Elementwise per-element loss values for one group (cast to f32 in-kernel)."""
    if kind == "nll":
        mu = refs[0][...].astype(jnp.float32)
        lv = refs[1][...].astype(jnp.float32)
        y = refs[2][...].astype(jnp.float32)
        return jnp.abs(mu - y) * jnp.exp(lv * -0.5) + lv * 0.5
    if kind == "dur":
        d = refs[0][...].astype(jnp.float32)
        tgt = jnp.log(refs[1][...].astype(jnp.float32) + 1.0)
        return jnp.square(d - tgt)
    # KL(q || p)
    mq = refs[0][...].astype(jnp.float32)
    lq = refs[1][...].astype(jnp.float32)
    mp = refs[2][...].astype(jnp.float32)
    lp = refs[3][...].astype(jnp.float32)
    return 0.5 * (lp - lq + jnp.exp(lq - lp)
                  + jnp.square(mq - mp) * jnp.exp(-lp) - 1.0)


def _lane_fold(x, width=128, ways=8):
    """(R, T) -> (R, width) via aligned 128-lane column adds (pure VALU, no XLU)."""
    t = x.shape[-1]
    n = t // width
    if n <= 1:
        return x
    k = min(ways, n)
    accs = [x[:, c * width:(c + 1) * width] for c in range(k)]
    for c in range(k, n):
        accs[c % k] = accs[c % k] + x[:, c * width:(c + 1) * width]
    out = accs[0]
    for a in accs[1:]:
        out = out + a
    return out


# ---------------------------------------------------------------------------
# fused kernel factory
# plan entry: (kind, loss_idx, rows, fsub, tile, nt, streamed, n_arrays)
# ---------------------------------------------------------------------------
def _make_kernel(plan, grid_nt, num_losses):
    n_streamed = sum(1 for p in plan if p[6])

    def kernel(*refs):
        # ---- unpack refs: per group [limit, data...], then out, then acc scratch
        pos = 0
        lim_refs, data_refs = [], []
        for p in plan:
            lim_refs.append(refs[pos]); pos += 1
            data_refs.append(refs[pos:pos + p[7]]); pos += p[7]
        out_ref = refs[pos]; pos += 1
        acc_refs = {}
        for gi, p in enumerate(plan):
            if p[6]:
                acc_refs[gi] = refs[pos]; pos += 1

        i = pl.program_id(0)

        if n_streamed:
            @pl.when(i == 0)
            def _init():
                for gi in acc_refs:
                    acc_refs[gi][...] = jnp.zeros_like(acc_refs[gi])

        # Hoisted lane-index iotas, shared by groups with the same tile shape.
        col_cache = {}
        for (kind, k, rows, fsub, tile, nt, streamed, n) in plan:
            if streamed and (rows, tile) not in col_cache:
                col_cache[(rows, tile)] = (
                    jax.lax.broadcasted_iota(jnp.int32, (rows, tile), 1) + i * tile)

        # ---- streamed groups: masked VALU lane-partial added into VMEM acc ----
        for gi, (kind, k, rows, fsub, tile, nt, streamed, n) in enumerate(plan):
            if not streamed:
                continue

            def body(gi=gi, kind=kind, rows=rows, tile=tile):
                vals = _group_vals(kind, data_refs[gi])
                # select (not multiply): OOB / padded garbage (possibly Inf/NaN
                # after exp) never propagates.
                masked = jnp.where(col_cache[(rows, tile)] < lim_refs[gi][...],
                                   vals, 0.0)
                acc_refs[gi][...] = acc_refs[gi][...] + _lane_fold(masked)

            if nt >= grid_nt:
                body()
            else:
                pl.when(i < nt)(body)

        # ---- final grid step: resident groups once + one XLU reduce per loss --
        @pl.when(i == grid_nt - 1)
        def _fin():
            for gi, (kind, k, rows, fsub, tile, nt, streamed, n) in enumerate(plan):
                if streamed:
                    out_ref[k] = jnp.sum(acc_refs[gi][...])
                else:
                    vals = _group_vals(kind, data_refs[gi])
                    col = jax.lax.broadcasted_iota(jnp.int32, (rows, fsub), 1)
                    out_ref[k] = jnp.sum(
                        jnp.where(col < lim_refs[gi][...], vals, 0.0))

    return kernel


# ---------------------------------------------------------------------------
# wrapper
# ---------------------------------------------------------------------------
@functools.partial(jax.jit, static_argnames=("resident_bytes", "max_tile"))
def _vae_loss_forward(mu, ln_var, d_outs, ys, ds, ilens, olens, stats1, stats2,
                      *, resident_bytes=_RESIDENT_BYTES_DEFAULT,
                      max_tile=_MAX_TILE_DEFAULT):
    B, lmax, odim = ys.shape
    n1, n2 = len(stats1), len(stats2)
    max_tile = max(128, (int(max_tile) // 128) * 128)
    budget, vmem_limit = _vmem_caps()

    # ---- build flattened, sublane-packed groups + per-row prefix limits ------
    def make_group(arrays2d, lens, per_frame, kind):
        F = arrays2d[0].shape[1]
        S = _pack_factor(B, F)
        rows, fsub = B * S, F // S
        data = [a.reshape(rows, fsub) for a in arrays2d]
        base = lens.astype(jnp.int32).reshape(B, 1) * per_frame          # (B,1)
        sub = (jnp.arange(S, dtype=jnp.int32) * fsub)[None, :]           # (1,S)
        lim = jnp.clip(base - sub, 0, fsub).reshape(rows, 1)             # (rows,1)
        return {"kind": kind, "data": data, "lim": lim,
                "rows": rows, "fsub": fsub, "n": len(data)}

    groups = [
        make_group([mu.reshape(B, -1), ln_var.reshape(B, -1), ys.reshape(B, -1)],
                   olens, odim, "nll"),
        make_group([d_outs, ds], ilens, 1, "dur"),
    ]
    for s in stats1:
        groups.append(make_group([t.reshape(B, -1) for t in s],
                                 ilens, s[0].shape[-1], "kl"))
    for s in stats2:
        groups.append(make_group([t.reshape(B, -1) for t in s],
                                 olens, s[0].shape[-1], "kl"))
    num_losses = len(groups)

    # ---- static, VMEM-budgeted tiling plan -----------------------------------
    for g in groups:
        full_bytes = g["rows"] * g["fsub"] * 4 * g["n"]
        g["resident"] = (full_bytes <= resident_bytes) or (g["fsub"] < 256)

    def tile_for(g, nt):
        if g["resident"]:
            return g["fsub"]
        return min(_round_up(_cdiv(g["fsub"], nt), 128), max_tile)

    def vmem_est(nt):   # double-buffered input blocks
        return sum(2 * g["rows"] * tile_for(g, nt) * 4 * g["n"] for g in groups)

    num_tiles = 1
    for g in groups:
        if not g["resident"]:
            num_tiles = max(num_tiles, _cdiv(g["fsub"], max_tile))
    while vmem_est(num_tiles) > budget and num_tiles < (1 << 16):
        num_tiles += max(1, num_tiles // 4)

    grid_nt = 1
    plan = []
    for k, g in enumerate(groups):
        tile = tile_for(g, num_tiles)
        if g["resident"] or tile >= g["fsub"]:
            tile, nt, streamed = g["fsub"], 1, False
        else:
            nt, streamed = _cdiv(g["fsub"], tile), True
        grid_nt = max(grid_nt, nt)
        plan.append((g["kind"], k, g["rows"], g["fsub"], tile, nt, streamed, g["n"]))

    # ---- assemble pallas_call -------------------------------------------------
    in_specs, inputs, scratch = [], [], []
    for g, (_, _, rows, fsub, tile, nt, streamed, _) in zip(groups, plan):
        in_specs.append(pl.BlockSpec((rows, 1), _const_map))
        inputs.append(g["lim"])
        spec = (pl.BlockSpec((rows, tile), _clamped_map(nt)) if streamed
                else pl.BlockSpec((rows, fsub), _const_map))
        for a in g["data"]:
            in_specs.append(spec)
            inputs.append(a)
        if streamed:
            scratch.append(pltpu.VMEM((rows, 128), jnp.float32))

    kernel = _make_kernel(tuple(plan), grid_nt, num_losses)

    nums = pl.pallas_call(
        kernel,
        grid=(grid_nt,),
        in_specs=in_specs,
        out_specs=pl.BlockSpec((num_losses,), lambda i: (0,),
                               memory_space=pltpu.MemorySpace.SMEM),
        out_shape=jax.ShapeDtypeStruct((num_losses,), jnp.float32),
        scratch_shapes=scratch,
        compiler_params=pltpu.CompilerParams(
            dimension_semantics=("arbitrary",),
            vmem_limit_bytes=vmem_limit),
    )(*inputs)

    # ---- normalization (cheap scalar math, outside the kernel) ----------------
    denom_in = jnp.sum(ilens.astype(jnp.float32))
    denom_out = jnp.sum(olens.astype(jnp.float32))
    inv_n = 1.0 / float(odim)

    l1_loss = nums[0] * inv_n / denom_out
    duration_loss = nums[1] / denom_in
    kls = [nums[2 + k] * inv_n / denom_in for k in range(n1)] + \
          [nums[2 + n1 + k] * inv_n / denom_out for k in range(n2)]
    return l1_loss, duration_loss, kls


class VAELossPallas:
    """Pallas port of espnet2 VAELoss (use_masking=True path)."""

    def __init__(self, use_masking=True, use_weighted_masking=False,
                 resident_bytes=_RESIDENT_BYTES_DEFAULT,
                 max_tile=_MAX_TILE_DEFAULT):
        assert use_masking != use_weighted_masking or not use_masking
        # TODO(synk): use_weighted_masking branch not implemented (reference
        # PyTorch code for that branch is itself inconsistent for KL lists).
        assert use_masking and not use_weighted_masking
        self.use_masking = use_masking
        self.resident_bytes = int(resident_bytes)
        self.max_tile = int(max_tile)

    def __call__(self, mu, ln_var, d_outs, ys, ds, ilens, olens, stats1, stats2):
        return _vae_loss_forward(
            mu, ln_var, d_outs, ys, ds, ilens, olens,
            tuple(tuple(s) for s in stats1),
            tuple(tuple(s) for s in stats2),
            resident_bytes=self.resident_bytes, max_tile=self.max_tile)


# ---------------------------------------------------------------------------
# Pure-JAX reference (sanity check)
# ---------------------------------------------------------------------------
def _reference(mu, ln_var, d_outs, ys, ds, ilens, olens, stats1, stats2):
    n = ys.shape[-1]
    tmax, lmax = d_outs.shape[1], ys.shape[1]
    in_mask = jnp.arange(tmax)[None, :] < ilens[:, None]
    out_mask = jnp.arange(lmax)[None, :] < olens[:, None]

    def masked_mean(x, m):
        mf = m.astype(jnp.float32)
        return jnp.sum(x * mf) / jnp.sum(mf)

    nll = jnp.abs(mu - ys) * jnp.exp(-0.5 * ln_var) + 0.5 * ln_var
    l1 = masked_mean(jnp.sum(nll, -1) / n, out_mask)
    dur = masked_mean((d_outs - jnp.log(ds.astype(jnp.float32) + 1.0)) ** 2, in_mask)

    def kl(s):
        mu_q, lv_q, mu_p, lv_p = s
        k = 0.5 * (lv_p - lv_q + jnp.exp(lv_q - lv_p)
                   + jnp.square(mu_q - mu_p) * jnp.exp(-lv_p) - 1.0)
        return jnp.sum(k, -1) / n

    kls = [masked_mean(kl(s), in_mask) for s in stats1] + \
          [masked_mean(kl(s), out_mask) for s in stats2]
    return l1, dur, kls


# ---------------------------------------------------------------------------
if __name__ == "__main__":
    key = jax.random.PRNGKey(0)

    def make_stats(shape, k):
        ks = jax.random.split(k, 4)
        return (jax.random.normal(ks[0], shape, jnp.float32),
                0.1 * jax.random.normal(ks[1], shape, jnp.float32),
                jax.random.normal(ks[2], shape, jnp.float32),
                0.1 * jax.random.normal(ks[3], shape, jnp.float32))

    def build_inputs(k, B, Lmax, Tmax, odim, zdim):
        keys = jax.random.split(k, 10)
        ki = iter(keys)
        mu = jax.random.normal(next(ki), (B, Lmax, odim), jnp.float32)
        ln_var = 0.1 * jax.random.normal(next(ki), (B, Lmax, odim), jnp.float32)
        ys = jax.random.normal(next(ki), (B, Lmax, odim), jnp.float32)
        d_outs = jax.random.normal(next(ki), (B, Tmax), jnp.float32)
        ds = jax.random.randint(next(ki), (B, Tmax), 0, 5).astype(jnp.int32)
        ilens = jnp.array([Tmax, Tmax - 3], dtype=jnp.int32)[:B]
        olens = jnp.array([Lmax, Lmax - 5], dtype=jnp.int32)[:B]
        stats1 = [make_stats((B, Tmax, zdim), next(ki)) for _ in range(2)]
        stats2 = [make_stats((B, Lmax, zdim), next(ki)) for _ in range(2)]
        return mu, ln_var, d_outs, ys, ds, ilens, olens, stats1, stats2

    def check(args, loss_fn, atol, rtol):
        l1_r, dur_r, kls_r = _reference(*args)
        l1, dur, kls = loss_fn(*args)
        jax.block_until_ready((l1, dur, kls))
        assert jnp.allclose(l1, l1_r, atol=atol, rtol=rtol), (l1, l1_r)
        assert jnp.allclose(dur, dur_r, atol=atol, rtol=rtol), (dur, dur_r)
        for a, b in zip(kls, kls_r):
            assert jnp.allclose(a, b, atol=atol, rtol=rtol), (a, b)

    k1, k2 = jax.random.split(key)

    # 1) small shapes, default plan: every group resident, single grid step.
    args_small = build_inputs(k1, B=2, Lmax=16, Tmax=8, odim=32, zdim=16)
    check(args_small, VAELossPallas(), atol=1e-5, rtol=1e-5)

    # 2) moderate shapes with a tiny tile cap to force the streamed/accumulator
    #    path (multi-step grid, partial last tiles, mixed resident+streamed).
    args_med = build_inputs(k2, B=2, Lmax=80, Tmax=24, odim=48, zdim=32)
    check(args_med, VAELossPallas(resident_bytes=0, max_tile=256),
          atol=1e-4, rtol=1e-4)

    print("KERNEL_OK")
</pallas_src>

<mosaic_0001>
module attributes {stable_mosaic.version = 11 : i64} {
  func.func @kernel(%arg0: i32, %arg1: memref<8x1xi32, #tpu.memory_space<vmem>>, %arg2: memref<8x128xf32, #tpu.memory_space<vmem>>, %arg3: memref<8x128xf32, #tpu.memory_space<vmem>>, %arg4: memref<8x128xf32, #tpu.memory_space<vmem>>, %arg5: memref<8x1xi32, #tpu.memory_space<vmem>>, %arg6: memref<8x2xf32, #tpu.memory_space<vmem>>, %arg7: memref<8x2xi32, #tpu.memory_space<vmem>>, %arg8: memref<8x1xi32, #tpu.memory_space<vmem>>, %arg9: memref<8x32xf32, #tpu.memory_space<vmem>>, %arg10: memref<8x32xf32, #tpu.memory_space<vmem>>, %arg11: memref<8x32xf32, #tpu.memory_space<vmem>>, %arg12: memref<8x32xf32, #tpu.memory_space<vmem>>, %arg13: memref<8x1xi32, #tpu.memory_space<vmem>>, %arg14: memref<8x32xf32, #tpu.memory_space<vmem>>, %arg15: memref<8x32xf32, #tpu.memory_space<vmem>>, %arg16: memref<8x32xf32, #tpu.memory_space<vmem>>, %arg17: memref<8x32xf32, #tpu.memory_space<vmem>>, %arg18: memref<8x1xi32, #tpu.memory_space<vmem>>, %arg19: memref<8x64xf32, #tpu.memory_space<vmem>>, %arg20: memref<8x64xf32, #tpu.memory_space<vmem>>, %arg21: memref<8x64xf32, #tpu.memory_space<vmem>>, %arg22: memref<8x64xf32, #tpu.memory_space<vmem>>, %arg23: memref<8x1xi32, #tpu.memory_space<vmem>>, %arg24: memref<8x64xf32, #tpu.memory_space<vmem>>, %arg25: memref<8x64xf32, #tpu.memory_space<vmem>>, %arg26: memref<8x64xf32, #tpu.memory_space<vmem>>, %arg27: memref<8x64xf32, #tpu.memory_space<vmem>>, %arg28: memref<6xf32, #tpu.memory_space<smem>>) attributes {dimension_semantics = [#tpu.dimension_semantics<arbitrary>], iteration_bounds = array<i64: 1>, scalar_prefetch = 0 : i64, scratch_operands = 0 : i64, tpu.core_type = #tpu.core_type<tc>, window_params = [{pipeline_mode = #tpu.pipeline_mode<synchronous>, transform_indices = @transform_0, window_bounds = array<i64: 8, 1>}, {pipeline_mode = #tpu.pipeline_mode<synchronous>, transform_indices = @transform_1, window_bounds = array<i64: 8, 128>}, {pipeline_mode = #tpu.pipeline_mode<synchronous>, transform_indices = @transform_2, window_bounds = array<i64: 8, 128>}, {pipeline_mode = #tpu.pipeline_mode<synchronous>, transform_indices = @transform_3, window_bounds = array<i64: 8, 128>}, {pipeline_mode = #tpu.pipeline_mode<synchronous>, transform_indices = @transform_4, window_bounds = array<i64: 8, 1>}, {pipeline_mode = #tpu.pipeline_mode<synchronous>, transform_indices = @transform_5, window_bounds = array<i64: 8, 2>}, {pipeline_mode = #tpu.pipeline_mode<synchronous>, transform_indices = @transform_6, window_bounds = array<i64: 8, 2>}, {pipeline_mode = #tpu.pipeline_mode<synchronous>, transform_indices = @transform_7, window_bounds = array<i64: 8, 1>}, {pipeline_mode = #tpu.pipeline_mode<synchronous>, transform_indices = @transform_8, window_bounds = array<i64: 8, 32>}, {pipeline_mode = #tpu.pipeline_mode<synchronous>, transform_indices = @transform_9, window_bounds = array<i64: 8, 32>}, {pipeline_mode = #tpu.pipeline_mode<synchronous>, transform_indices = @transform_10, window_bounds = array<i64: 8, 32>}, {pipeline_mode = #tpu.pipeline_mode<synchronous>, transform_indices = @transform_11, window_bounds = array<i64: 8, 32>}, {pipeline_mode = #tpu.pipeline_mode<synchronous>, transform_indices = @transform_12, window_bounds = array<i64: 8, 1>}, {pipeline_mode = #tpu.pipeline_mode<synchronous>, transform_indices = @transform_13, window_bounds = array<i64: 8, 32>}, {pipeline_mode = #tpu.pipeline_mode<synchronous>, transform_indices = @transform_14, window_bounds = array<i64: 8, 32>}, {pipeline_mode = #tpu.pipeline_mode<synchronous>, transform_indices = @transform_15, window_bounds = array<i64: 8, 32>}, {pipeline_mode = #tpu.pipeline_mode<synchronous>, transform_indices = @transform_16, window_bounds = array<i64: 8, 32>}, {pipeline_mode = #tpu.pipeline_mode<synchronous>, transform_indices = @transform_17, window_bounds = array<i64: 8, 1>}, {pipeline_mode = #tpu.pipeline_mode<synchronous>, transform_indices = @transform_18, window_bounds = array<i64: 8, 64>}, {pipeline_mode = #tpu.pipeline_mode<synchronous>, transform_indices = @transform_19, window_bounds = array<i64: 8, 64>}, {pipeline_mode = #tpu.pipeline_mode<synchronous>, transform_indices = @transform_20, window_bounds = array<i64: 8, 64>}, {pipeline_mode = #tpu.pipeline_mode<synchronous>, transform_indices = @transform_21, window_bounds = array<i64: 8, 64>}, {pipeline_mode = #tpu.pipeline_mode<synchronous>, transform_indices = @transform_22, window_bounds = array<i64: 8, 1>}, {pipeline_mode = #tpu.pipeline_mode<synchronous>, transform_indices = @transform_23, window_bounds = array<i64: 8, 64>}, {pipeline_mode = #tpu.pipeline_mode<synchronous>, transform_indices = @transform_24, window_bounds = array<i64: 8, 64>}, {pipeline_mode = #tpu.pipeline_mode<synchronous>, transform_indices = @transform_25, window_bounds = array<i64: 8, 64>}, {pipeline_mode = #tpu.pipeline_mode<synchronous>, transform_indices = @transform_26, window_bounds = array<i64: 8, 64>}, {transform_indices = @transform_27, window_bounds = array<i64: 6>}]} {
    %c0_i32 = arith.constant 0 : i32
    %0 = arith.cmpi eq, %arg0, %c0_i32 : i32
    %1 = arith.extui %0 : i1 to i32
    %c0_i32_0 = arith.constant 0 : i32
    %2 = arith.cmpi ne, %1, %c0_i32_0 : i32
    scf.if %2 {
      %c0 = arith.constant 0 : index
      %c0_1 = arith.constant 0 : index
      %3 = vector.load %arg2[%c0, %c0_1] : memref<8x128xf32, #tpu.memory_space<vmem>>, vector<8x128xf32>
      %c0_2 = arith.constant 0 : index
      %c0_3 = arith.constant 0 : index
      %4 = vector.load %arg3[%c0_2, %c0_3] : memref<8x128xf32, #tpu.memory_space<vmem>>, vector<8x128xf32>
      %c0_4 = arith.constant 0 : index
      %c0_5 = arith.constant 0 : index
      %5 = vector.load %arg4[%c0_4, %c0_5] : memref<8x128xf32, #tpu.memory_space<vmem>>, vector<8x128xf32>
      %6 = arith.subf %3, %5 : vector<8x128xf32>
      %7 = math.absf %6 : vector<8x128xf32>
      %cst = arith.constant -5.000000e-01 : f32
      %8 = vector.broadcast %cst : f32 to vector<8x128xf32>
      %9 = arith.mulf %4, %8 : vector<8x128xf32>
      %10 = math.exp %9 : vector<8x128xf32>
      %11 = arith.mulf %7, %10 : vector<8x128xf32>
      %cst_6 = arith.constant 5.000000e-01 : f32
      %12 = vector.broadcast %cst_6 : f32 to vector<8x128xf32>
      %13 = arith.mulf %4, %12 : vector<8x128xf32>
      %14 = arith.addf %11, %13 : vector<8x128xf32>
      %15 = tpu.iota {dimensions = array<i32: 1>} : vector<8x128xi32>
      %c0_7 = arith.constant 0 : index
      %c0_8 = arith.constant 0 : index
      %16 = vector.load %arg1[%c0_7, %c0_8] : memref<8x1xi32, #tpu.memory_space<vmem>>, vector<8x1xi32>
      %17 = vector.broadcast %16 : vector<8x1xi32> to vector<8x128xi32>
      %18 = arith.cmpi slt, %15, %17 : vector<8x128xi32>
      %cst_9 = arith.constant 0.000000e+00 : f32
      %19 = vector.broadcast %cst_9 : f32 to vector<8x128xf32>
      %20 = arith.select %18, %14, %19 : vector<8x128xi1>, vector<8x128xf32>
      %21 = vector.shape_cast %20 : vector<8x128xf32> to vector<1x8x128xf32>
      %cst_10 = arith.constant dense<0.000000e+00> : vector<1xf32>
      %22 = vector.multi_reduction <add>, %21, %cst_10 [1, 2] : vector<1x8x128xf32> to vector<1xf32>
      %23 = vector.shape_cast %22 : vector<1xf32> to vector<1x1x1xf32>
      %24 = vector.extract %23[0, 0, 0] : f32 from vector<1x1x1xf32>
      %c0_11 = arith.constant 0 : index
      %25 = memref.load %arg28[%c0_11] : memref<6xf32, #tpu.memory_space<smem>>
      memref.store %24, %arg28[%c0_11] : memref<6xf32, #tpu.memory_space<smem>>
      %c0_12 = arith.constant 0 : index
      %c0_13 = arith.constant 0 : index
      %26 = vector.load %arg6[%c0_12, %c0_13] : memref<8x2xf32, #tpu.memory_space<vmem>>, vector<8x2xf32>
      %c0_14 = arith.constant 0 : index
      %c0_15 = arith.constant 0 : index
      %27 = vector.load %arg7[%c0_14, %c0_15] : memref<8x2xi32, #tpu.memory_space<vmem>>, vector<8x2xi32>
      %28 = arith.sitofp %27 : vector<8x2xi32> to vector<8x2xf32>
      %cst_16 = arith.constant 1.000000e+00 : f32
      %29 = vector.broadcast %cst_16 : f32 to vector<8x2xf32>
      %30 = arith.addf %28, %29 : vector<8x2xf32>
      %31 = math.log %30 : vector<8x2xf32>
      %32 = arith.subf %26, %31 : vector<8x2xf32>
      %33 = arith.mulf %32, %32 : vector<8x2xf32>
      %34 = tpu.iota {dimensions = array<i32: 1>} : vector<8x2xi32>
      %c0_17 = arith.constant 0 : index
      %c0_18 = arith.constant 0 : index
      %35 = vector.load %arg5[%c0_17, %c0_18] : memref<8x1xi32, #tpu.memory_space<vmem>>, vector<8x1xi32>
      %36 = vector.broadcast %35 : vector<8x1xi32> to vector<8x2xi32>
      %37 = arith.cmpi slt, %34, %36 : vector<8x2xi32>
      %cst_19 = arith.constant 0.000000e+00 : f32
      %38 = vector.broadcast %cst_19 : f32 to vector<8x2xf32>
      %39 = arith.select %37, %33, %38 : vector<8x2xi1>, vector<8x2xf32>
      %40 = vector.shape_cast %39 : vector<8x2xf32> to vector<1x8x2xf32>
      %cst_20 = arith.constant dense<0.000000e+00> : vector<1xf32>
      %41 = vector.multi_reduction <add>, %40, %cst_20 [1, 2] : vector<1x8x2xf32> to vector<1xf32>
      %42 = vector.shape_cast %41 : vector<1xf32> to vector<1x1x1xf32>
      %43 = vector.extract %42[0, 0, 0] : f32 from vector<1x1x1xf32>
      %c1 = arith.constant 1 : index
      %44 = memref.load %arg28[%c1] : memref<6xf32, #tpu.memory_space<smem>>
      memref.store %43, %arg28[%c1] : memref<6xf32, #tpu.memory_space<smem>>
      %c0_21 = arith.constant 0 : index
      %c0_22 = arith.constant 0 : index
      %45 = vector.load %arg9[%c0_21, %c0_22] : memref<8x32xf32, #tpu.memory_space<vmem>>, vector<8x32xf32>
      %c0_23 = arith.constant 0 : index
      %c0_24 = arith.constant 0 : index
      %46 = vector.load %arg10[%c0_23, %c0_24] : memref<8x32xf32, #tpu.memory_space<vmem>>, vector<8x32xf32>
      %c0_25 = arith.constant 0 : index
      %c0_26 = arith.constant 0 : index
      %47 = vector.load %arg11[%c0_25, %c0_26] : memref<8x32xf32, #tpu.memory_space<vmem>>, vector<8x32xf32>
      %c0_27 = arith.constant 0 : index
      %c0_28 = arith.constant 0 : index
      %48 = vector.load %arg12[%c0_27, %c0_28] : memref<8x32xf32, #tpu.memory_space<vmem>>, vector<8x32xf32>
      %49 = arith.subf %48, %46 : vector<8x32xf32>
      %50 = arith.subf %46, %48 : vector<8x32xf32>
      %51 = math.exp %50 : vector<8x32xf32>
      %52 = arith.addf %49, %51 : vector<8x32xf32>
      %53 = arith.subf %45, %47 : vector<8x32xf32>
      %54 = arith.mulf %53, %53 : vector<8x32xf32>
      %cst_29 = arith.constant 0.000000e+00 : f32
      %55 = vector.broadcast %cst_29 : f32 to vector<8x32xf32>
      %56 = arith.subf %55, %48 : vector<8x32xf32>
      %57 = math.exp %56 : vector<8x32xf32>
      %58 = arith.mulf %54, %57 : vector<8x32xf32>
      %59 = arith.addf %52, %58 : vector<8x32xf32>
      %cst_30 = arith.constant 1.000000e+00 : f32
      %60 = vector.broadcast %cst_30 : f32 to vector<8x32xf32>
      %61 = arith.subf %59, %60 : vector<8x32xf32>
      %cst_31 = arith.constant 5.000000e-01 : f32
      %62 = vector.broadcast %cst_31 : f32 to vector<8x32xf32>
      %63 = arith.mulf %62, %61 : vector<8x32xf32>
      %64 = tpu.iota {dimensions = array<i32: 1>} : vector<8x32xi32>
      %c0_32 = arith.constant 0 : index
      %c0_33 = arith.constant 0 : index
      %65 = vector.load %arg8[%c0_32, %c0_33] : memref<8x1xi32, #tpu.memory_space<vmem>>, vector<8x1xi32>
      %66 = vector.broadcast %65 : vector<8x1xi32> to vector<8x32xi32>
      %67 = arith.cmpi slt, %64, %66 : vector<8x32xi32>
      %cst_34 = arith.constant 0.000000e+00 : f32
      %68 = vector.broadcast %cst_34 : f32 to vector<8x32xf32>
      %69 = arith.select %67, %63, %68 : vector<8x32xi1>, vector<8x32xf32>
      %70 = vector.shape_cast %69 : vector<8x32xf32> to vector<1x8x32xf32>
      %cst_35 = arith.constant dense<0.000000e+00> : vector<1xf32>
      %71 = vector.multi_reduction <add>, %70, %cst_35 [1, 2] : vector<1x8x32xf32> to vector<1xf32>
      %72 = vector.shape_cast %71 : vector<1xf32> to vector<1x1x1xf32>
      %73 = vector.extract %72[0, 0, 0] : f32 from vector<1x1x1xf32>
      %c2 = arith.constant 2 : index
      %74 = memref.load %arg28[%c2] : memref<6xf32, #tpu.memory_space<smem>>
      memref.store %73, %arg28[%c2] : memref<6xf32, #tpu.memory_space<smem>>
      %c0_36 = arith.constant 0 : index
      %c0_37 = arith.constant 0 : index
      %75 = vector.load %arg14[%c0_36, %c0_37] : memref<8x32xf32, #tpu.memory_space<vmem>>, vector<8x32xf32>
      %c0_38 = arith.constant 0 : index
      %c0_39 = arith.constant 0 : index
      %76 = vector.load %arg15[%c0_38, %c0_39] : memref<8x32xf32, #tpu.memory_space<vmem>>, vector<8x32xf32>
      %c0_40 = arith.constant 0 : index
      %c0_41 = arith.constant 0 : index
      %77 = vector.load %arg16[%c0_40, %c0_41] : memref<8x32xf32, #tpu.memory_space<vmem>>, vector<8x32xf32>
      %c0_42 = arith.constant 0 : index
      %c0_43 = arith.constant 0 : index
      %78 = vector.load %arg17[%c0_42, %c0_43] : memref<8x32xf32, #tpu.memory_space<vmem>>, vector<8x32xf32>
      %79 = arith.subf %78, %76 : vector<8x32xf32>
      %80 = arith.subf %76, %78 : vector<8x32xf32>
      %81 = math.exp %80 : vector<8x32xf32>
      %82 = arith.addf %79, %81 : vector<8x32xf32>
      %83 = arith.subf %75, %77 : vector<8x32xf32>
      %84 = arith.mulf %83, %83 : vector<8x32xf32>
      %cst_44 = arith.constant 0.000000e+00 : f32
      %85 = vector.broadcast %cst_44 : f32 to vector<8x32xf32>
      %86 = arith.subf %85, %78 : vector<8x32xf32>
      %87 = math.exp %86 : vector<8x32xf32>
      %88 = arith.mulf %84, %87 : vector<8x32xf32>
      %89 = arith.addf %82, %88 : vector<8x32xf32>
      %cst_45 = arith.constant 1.000000e+00 : f32
      %90 = vector.broadcast %cst_45 : f32 to vector<8x32xf32>
      %91 = arith.subf %89, %90 : vector<8x32xf32>
      %cst_46 = arith.constant 5.000000e-01 : f32
      %92 = vector.broadcast %cst_46 : f32 to vector<8x32xf32>
      %93 = arith.mulf %92, %91 : vector<8x32xf32>
      %94 = tpu.iota {dimensions = array<i32: 1>} : vector<8x32xi32>
      %c0_47 = arith.constant 0 : index
      %c0_48 = arith.constant 0 : index
      %95 = vector.load %arg13[%c0_47, %c0_48] : memref<8x1xi32, #tpu.memory_space<vmem>>, vector<8x1xi32>
      %96 = vector.broadcast %95 : vector<8x1xi32> to vector<8x32xi32>
      %97 = arith.cmpi slt, %94, %96 : vector<8x32xi32>
      %cst_49 = arith.constant 0.000000e+00 : f32
      %98 = vector.broadcast %cst_49 : f32 to vector<8x32xf32>
      %99 = arith.select %97, %93, %98 : vector<8x32xi1>, vector<8x32xf32>
      %100 = vector.shape_cast %99 : vector<8x32xf32> to vector<1x8x32xf32>
      %cst_50 = arith.constant dense<0.000000e+00> : vector<1xf32>
      %101 = vector.multi_reduction <add>, %100, %cst_50 [1, 2] : vector<1x8x32xf32> to vector<1xf32>
      %102 = vector.shape_cast %101 : vector<1xf32> to vector<1x1x1xf32>
      %103 = vector.extract %102[0, 0, 0] : f32 from vector<1x1x1xf32>
      %c3 = arith.constant 3 : index
      %104 = memref.load %arg28[%c3] : memref<6xf32, #tpu.memory_space<smem>>
      memref.store %103, %arg28[%c3] : memref<6xf32, #tpu.memory_space<smem>>
      %c0_51 = arith.constant 0 : index
      %c0_52 = arith.constant 0 : index
      %105 = vector.load %arg19[%c0_51, %c0_52] : memref<8x64xf32, #tpu.memory_space<vmem>>, vector<8x64xf32>
      %c0_53 = arith.constant 0 : index
      %c0_54 = arith.constant 0 : index
      %106 = vector.load %arg20[%c0_53, %c0_54] : memref<8x64xf32, #tpu.memory_space<vmem>>, vector<8x64xf32>
      %c0_55 = arith.constant 0 : index
      %c0_56 = arith.constant 0 : index
      %107 = vector.load %arg21[%c0_55, %c0_56] : memref<8x64xf32, #tpu.memory_space<vmem>>, vector<8x64xf32>
      %c0_57 = arith.constant 0 : index
      %c0_58 = arith.constant 0 : index
      %108 = vector.load %arg22[%c0_57, %c0_58] : memref<8x64xf32, #tpu.memory_space<vmem>>, vector<8x64xf32>
      %109 = arith.subf %108, %106 : vector<8x64xf32>
      %110 = arith.subf %106, %108 : vector<8x64xf32>
      %111 = math.exp %110 : vector<8x64xf32>
      %112 = arith.addf %109, %111 : vector<8x64xf32>
      %113 = arith.subf %105, %107 : vector<8x64xf32>
      %114 = arith.mulf %113, %113 : vector<8x64xf32>
      %cst_59 = arith.constant 0.000000e+00 : f32
      %115 = vector.broadcast %cst_59 : f32 to vector<8x64xf32>
      %116 = arith.subf %115, %108 : vector<8x64xf32>
      %117 = math.exp %116 : vector<8x64xf32>
      %118 = arith.mulf %114, %117 : vector<8x64xf32>
      %119 = arith.addf %112, %118 : vector<8x64xf32>
      %cst_60 = arith.constant 1.000000e+00 : f32
      %120 = vector.broadcast %cst_60 : f32 to vector<8x64xf32>
      %121 = arith.subf %119, %120 : vector<8x64xf32>
      %cst_61 = arith.constant 5.000000e-01 : f32
      %122 = vector.broadcast %cst_61 : f32 to vector<8x64xf32>
      %123 = arith.mulf %122, %121 : vector<8x64xf32>
      %124 = tpu.iota {dimensions = array<i32: 1>} : vector<8x64xi32>
      %c0_62 = arith.constant 0 : index
      %c0_63 = arith.constant 0 : index
      %125 = vector.load %arg18[%c0_62, %c0_63] : memref<8x1xi32, #tpu.memory_space<vmem>>, vector<8x1xi32>
      %126 = vector.broadcast %125 : vector<8x1xi32> to vector<8x64xi32>
      %127 = arith.cmpi slt, %124, %126 : vector<8x64xi32>
      %cst_64 = arith.constant 0.000000e+00 : f32
      %128 = vector.broadcast %cst_64 : f32 to vector<8x64xf32>
      %129 = arith.select %127, %123, %128 : vector<8x64xi1>, vector<8x64xf32>
      %130 = vector.shape_cast %129 : vector<8x64xf32> to vector<1x8x64xf32>
      %cst_65 = arith.constant dense<0.000000e+00> : vector<1xf32>
      %131 = vector.multi_reduction <add>, %130, %cst_65 [1, 2] : vector<1x8x64xf32> to vector<1xf32>
      %132 = vector.shape_cast %131 : vector<1xf32> to vector<1x1x1xf32>
      %133 = vector.extract %132[0, 0, 0] : f32 from vector<1x1x1xf32>
      %c4 = arith.constant 4 : index
      %134 = memref.load %arg28[%c4] : memref<6xf32, #tpu.memory_space<smem>>
      memref.store %133, %arg28[%c4] : memref<6xf32, #tpu.memory_space<smem>>
      %c0_66 = arith.constant 0 : index
      %c0_67 = arith.constant 0 : index
      %135 = vector.load %arg24[%c0_66, %c0_67] : memref<8x64xf32, #tpu.memory_space<vmem>>, vector<8x64xf32>
      %c0_68 = arith.constant 0 : index
      %c0_69 = arith.constant 0 : index
      %136 = vector.load %arg25[%c0_68, %c0_69] : memref<8x64xf32, #tpu.memory_space<vmem>>, vector<8x64xf32>
      %c0_70 = arith.constant 0 : index
      %c0_71 = arith.constant 0 : index
      %137 = vector.load %arg26[%c0_70, %c0_71] : memref<8x64xf32, #tpu.memory_space<vmem>>, vector<8x64xf32>
      %c0_72 = arith.constant 0 : index
      %c0_73 = arith.constant 0 : index
      %138 = vector.load %arg27[%c0_72, %c0_73] : memref<8x64xf32, #tpu.memory_space<vmem>>, vector<8x64xf32>
      %139 = arith.subf %138, %136 : vector<8x64xf32>
      %140 = arith.subf %136, %138 : vector<8x64xf32>
      %141 = math.exp %140 : vector<8x64xf32>
      %142 = arith.addf %139, %141 : vector<8x64xf32>
      %143 = arith.subf %135, %137 : vector<8x64xf32>
      %144 = arith.mulf %143, %143 : vector<8x64xf32>
      %cst_74 = arith.constant 0.000000e+00 : f32
      %145 = vector.broadcast %cst_74 : f32 to vector<8x64xf32>
      %146 = arith.subf %145, %138 : vector<8x64xf32>
      %147 = math.exp %146 : vector<8x64xf32>
      %148 = arith.mulf %144, %147 : vector<8x64xf32>
      %149 = arith.addf %142, %148 : vector<8x64xf32>
      %cst_75 = arith.constant 1.000000e+00 : f32
      %150 = vector.broadcast %cst_75 : f32 to vector<8x64xf32>
      %151 = arith.subf %149, %150 : vector<8x64xf32>
      %cst_76 = arith.constant 5.000000e-01 : f32
      %152 = vector.broadcast %cst_76 : f32 to vector<8x64xf32>
      %153 = arith.mulf %152, %151 : vector<8x64xf32>
      %154 = tpu.iota {dimensions = array<i32: 1>} : vector<8x64xi32>
      %c0_77 = arith.constant 0 : index
      %c0_78 = arith.constant 0 : index
      %155 = vector.load %arg23[%c0_77, %c0_78] : memref<8x1xi32, #tpu.memory_space<vmem>>, vector<8x1xi32>
      %156 = vector.broadcast %155 : vector<8x1xi32> to vector<8x64xi32>
      %157 = arith.cmpi slt, %154, %156 : vector<8x64xi32>
      %cst_79 = arith.constant 0.000000e+00 : f32
      %158 = vector.broadcast %cst_79 : f32 to vector<8x64xf32>
      %159 = arith.select %157, %153, %158 : vector<8x64xi1>, vector<8x64xf32>
      %160 = vector.shape_cast %159 : vector<8x64xf32> to vector<1x8x64xf32>
      %cst_80 = arith.constant dense<0.000000e+00> : vector<1xf32>
      %161 = vector.multi_reduction <add>, %160, %cst_80 [1, 2] : vector<1x8x64xf32> to vector<1xf32>
      %162 = vector.shape_cast %161 : vector<1xf32> to vector<1x1x1xf32>
      %163 = vector.extract %162[0, 0, 0] : f32 from vector<1x1x1xf32>
      %c5 = arith.constant 5 : index
      %164 = memref.load %arg28[%c5] : memref<6xf32, #tpu.memory_space<smem>>
      memref.store %163, %arg28[%c5] : memref<6xf32, #tpu.memory_space<smem>>
    } else {
    }
    return
  }
  func.func @transform_0(%arg0: i32) -> (i32, i32) {
    %c0_i32 = arith.constant 0 : i32
    %c0_i32_0 = arith.constant 0 : i32
    %c0_i32_1 = arith.constant 0 : i32
    return %c0_i32, %c0_i32_0 : i32, i32
  }
  func.func @transform_1(%arg0: i32) -> (i32, i32) {
    %c0_i32 = arith.constant 0 : i32
    %c0_i32_0 = arith.constant 0 : i32
    %c0_i32_1 = arith.constant 0 : i32
    return %c0_i32, %c0_i32_0 : i32, i32
  }
  func.func @transform_2(%arg0: i32) -> (i32, i32) {
    %c0_i32 = arith.constant 0 : i32
    %c0_i32_0 = arith.constant 0 : i32
    %c0_i32_1 = arith.constant 0 : i32
    return %c0_i32, %c0_i32_0 : i32, i32
  }
  func.func @transform_3(%arg0: i32) -> (i32, i32) {
    %c0_i32 = arith.constant 0 : i32
    %c0_i32_0 = arith.constant 0 : i32
    %c0_i32_1 = arith.constant 0 : i32
    return %c0_i32, %c0_i32_0 : i32, i32
  }
  func.func @transform_4(%arg0: i32) -> (i32, i32) {
    %c0_i32 = arith.constant 0 : i32
    %c0_i32_0 = arith.constant 0 : i32
    %c0_i32_1 = arith.constant 0 : i32
    return %c0_i32, %c0_i32_0 : i32, i32
  }
  func.func @transform_5(%arg0: i32) -> (i32, i32) {
    %c0_i32 = arith.constant 0 : i32
    %c0_i32_0 = arith.constant 0 : i32
    %c0_i32_1 = arith.constant 0 : i32
    return %c0_i32, %c0_i32_0 : i32, i32
  }
  func.func @transform_6(%arg0: i32) -> (i32, i32) {
    %c0_i32 = arith.constant 0 : i32
    %c0_i32_0 = arith.constant 0 : i32
    %c0_i32_1 = arith.constant 0 : i32
    return %c0_i32, %c0_i32_0 : i32, i32
  }
  func.func @transform_7(%arg0: i32) -> (i32, i32) {
    %c0_i32 = arith.constant 0 : i32
    %c0_i32_0 = arith.constant 0 : i32
    %c0_i32_1 = arith.constant 0 : i32
    return %c0_i32, %c0_i32_0 : i32, i32
  }
  func.func @transform_8(%arg0: i32) -> (i32, i32) {
    %c0_i32 = arith.constant 0 : i32
    %c0_i32_0 = arith.constant 0 : i32
    %c0_i32_1 = arith.constant 0 : i32
    return %c0_i32, %c0_i32_0 : i32, i32
  }
  func.func @transform_9(%arg0: i32) -> (i32, i32) {
    %c0_i32 = arith.constant 0 : i32
    %c0_i32_0 = arith.constant 0 : i32
    %c0_i32_1 = arith.constant 0 : i32
    return %c0_i32, %c0_i32_0 : i32, i32
  }
  func.func @transform_10(%arg0: i32) -> (i32, i32) {
    %c0_i32 = arith.constant 0 : i32
    %c0_i32_0 = arith.constant 0 : i32
    %c0_i32_1 = arith.constant 0 : i32
    return %c0_i32, %c0_i32_0 : i32, i32
  }
  func.func @transform_11(%arg0: i32) -> (i32, i32) {
    %c0_i32 = arith.constant 0 : i32
    %c0_i32_0 = arith.constant 0 : i32
    %c0_i32_1 = arith.constant 0 : i32
    return %c0_i32, %c0_i32_0 : i32, i32
  }
  func.func @transform_12(%arg0: i32) -> (i32, i32) {
    %c0_i32 = arith.constant 0 : i32
    %c0_i32_0 = arith.constant 0 : i32
    %c0_i32_1 = arith.constant 0 : i32
    return %c0_i32, %c0_i32_0 : i32, i32
  }
  func.func @transform_13(%arg0: i32) -> (i32, i32) {
    %c0_i32 = arith.constant 0 : i32
    %c0_i32_0 = arith.constant 0 : i32
    %c0_i32_1 = arith.constant 0 : i32
    return %c0_i32, %c0_i32_0 : i32, i32
  }
  func.func @transform_14(%arg0: i32) -> (i32, i32) {
    %c0_i32 = arith.constant 0 : i32
    %c0_i32_0 = arith.constant 0 : i32
    %c0_i32_1 = arith.constant 0 : i32
    return %c0_i32, %c0_i32_0 : i32, i32
  }
  func.func @transform_15(%arg0: i32) -> (i32, i32) {
    %c0_i32 = arith.constant 0 : i32
    %c0_i32_0 = arith.constant 0 : i32
    %c0_i32_1 = arith.constant 0 : i32
    return %c0_i32, %c0_i32_0 : i32, i32
  }
  func.func @transform_16(%arg0: i32) -> (i32, i32) {
    %c0_i32 = arith.constant 0 : i32
    %c0_i32_0 = arith.constant 0 : i32
    %c0_i32_1 = arith.constant 0 : i32
    return %c0_i32, %c0_i32_0 : i32, i32
  }
  func.func @transform_17(%arg0: i32) -> (i32, i32) {
    %c0_i32 = arith.constant 0 : i32
    %c0_i32_0 = arith.constant 0 : i32
    %c0_i32_1 = arith.constant 0 : i32
    return %c0_i32, %c0_i32_0 : i32, i32
  }
  func.func @transform_18(%arg0: i32) -> (i32, i32) {
    %c0_i32 = arith.constant 0 : i32
    %c0_i32_0 = arith.constant 0 : i32
    %c0_i32_1 = arith.constant 0 : i32
    return %c0_i32, %c0_i32_0 : i32, i32
  }
  func.func @transform_19(%arg0: i32) -> (i32, i32) {
    %c0_i32 = arith.constant 0 : i32
    %c0_i32_0 = arith.constant 0 : i32
    %c0_i32_1 = arith.constant 0 : i32
    return %c0_i32, %c0_i32_0 : i32, i32
  }
  func.func @transform_20(%arg0: i32) -> (i32, i32) {
    %c0_i32 = arith.constant 0 : i32
    %c0_i32_0 = arith.constant 0 : i32
    %c0_i32_1 = arith.constant 0 : i32
    return %c0_i32, %c0_i32_0 : i32, i32
  }
  func.func @transform_21(%arg0: i32) -> (i32, i32) {
    %c0_i32 = arith.constant 0 : i32
    %c0_i32_0 = arith.constant 0 : i32
    %c0_i32_1 = arith.constant 0 : i32
    return %c0_i32, %c0_i32_0 : i32, i32
  }
  func.func @transform_22(%arg0: i32) -> (i32, i32) {
    %c0_i32 = arith.constant 0 : i32
    %c0_i32_0 = arith.constant 0 : i32
    %c0_i32_1 = arith.constant 0 : i32
    return %c0_i32, %c0_i32_0 : i32, i32
  }
  func.func @transform_23(%arg0: i32) -> (i32, i32) {
    %c0_i32 = arith.constant 0 : i32
    %c0_i32_0 = arith.constant 0 : i32
    %c0_i32_1 = arith.constant 0 : i32
    return %c0_i32, %c0_i32_0 : i32, i32
  }
  func.func @transform_24(%arg0: i32) -> (i32, i32) {
    %c0_i32 = arith.constant 0 : i32
    %c0_i32_0 = arith.constant 0 : i32
    %c0_i32_1 = arith.constant 0 : i32
    return %c0_i32, %c0_i32_0 : i32, i32
  }
  func.func @transform_25(%arg0: i32) -> (i32, i32) {
    %c0_i32 = arith.constant 0 : i32
    %c0_i32_0 = arith.constant 0 : i32
    %c0_i32_1 = arith.constant 0 : i32
    return %c0_i32, %c0_i32_0 : i32, i32
  }
  func.func @transform_26(%arg0: i32) -> (i32, i32) {
    %c0_i32 = arith.constant 0 : i32
    %c0_i32_0 = arith.constant 0 : i32
    %c0_i32_1 = arith.constant 0 : i32
    return %c0_i32, %c0_i32_0 : i32, i32
  }
  func.func @transform_27(%arg0: i32) -> i32 {
    %c0_i32 = arith.constant 0 : i32
    %c0_i32_0 = arith.constant 0 : i32
    return %c0_i32 : i32
  }
}

</mosaic_0001>

<bundles_post_ra>
// kernel: _vae_loss_forward.1
= control target key start
LH: loop header
LB: loop body
LE: loop exit
PB: predicated region body
PF: predicated region fallthrough
CT: control target
= control target key end

     0   :  { %s620_s0 = inlined_call_operand.vmem [shape: s32[8,1], index: 0, kind: input, shape index: {}]   ;;  %s621_s1 = inlined_call_operand.vmem [shape: f32[8,128], index: 1, kind: input, shape index: {}]   ;;  %s622_s2 = inlined_call_operand.vmem [shape: f32[8,128], index: 2, kind: input, shape index: {}]   ;;  %s623_s3 = inlined_call_operand.vmem [shape: f32[8,128], index: 3, kind: input, shape index: {}]   ;;  %s624_s4 = inlined_call_operand.vmem [shape: s32[8,1], index: 4, kind: input, shape index: {}]   ;;  %s625_s5 = inlined_call_operand.vmem [shape: f32[8,2], index: 5, kind: input, shape index: {}]   ;;  %s626_s6 = inlined_call_operand.vmem [shape: s32[8,2], index: 6, kind: input, shape index: {}]   ;;  %s627_s7 = inlined_call_operand.vmem [shape: s32[8,1], index: 7, kind: input, shape index: {}, may-alias: {7,12}]   ;;  %s628_s8 = inlined_call_operand.vmem [shape: f32[8,32], index: 8, kind: input, shape index: {}]   ;;  %s629_s9 = inlined_call_operand.vmem [shape: f32[8,32], index: 9, kind: input, shape index: {}]   ;;  %s630_s10 = inlined_call_operand.vmem [shape: f32[8,32], index: 10, kind: input, shape index: {}]   ;;  %s631_s11 = inlined_call_operand.vmem [shape: f32[8,32], index: 11, kind: input, shape index: {}]   ;;  %s632_s12 = inlined_call_operand.vmem [shape: s32[8,1], index: 12, kind: input, shape index: {}, may-alias: {7,12}]   ;;  %s633_s13 = inlined_call_operand.vmem [shape: f32[8,32], index: 13, kind: input, shape index: {}]   ;;  %s634_s14 = inlined_call_operand.vmem [shape: f32[8,32], index: 14, kind: input, shape index: {}]   ;;  %s635_s15 = inlined_call_operand.vmem [shape: f32[8,32], index: 15, kind: input, shape index: {}]   ;;  %s636_s16 = inlined_call_operand.vmem [shape: f32[8,32], index: 16, kind: input, shape index: {}]   ;;  %s637_s17 = inlined_call_operand.vmem [shape: s32[8,1], index: 17, kind: input, shape index: {}, may-alias: {17,22}]   ;;  %s638_s18 = inlined_call_operand.vmem [shape: f32[8,64], index: 18, kind: input, shape index: {}]   ;;  %s639_s19 = inlined_call_operand.vmem [shape: f32[8,64], index: 19, kind: input, shape index: {}]   ;;  %s640_s20 = inlined_call_operand.vmem [shape: f32[8,64], index: 20, kind: input, shape index: {}]   ;;  %s641_s21 = inlined_call_operand.vmem [shape: f32[8,64], index: 21, kind: input, shape index: {}]   ;;  %s642_s22 = inlined_call_operand.vmem [shape: s32[8,1], index: 22, kind: input, shape index: {}, may-alias: {17,22}]   ;;  %s643_s23 = inlined_call_operand.vmem [shape: f32[8,64], index: 23, kind: input, shape index: {}]   ;;  %s644_s24 = inlined_call_operand.vmem [shape: f32[8,64], index: 24, kind: input, shape index: {}]   ;;  %s645_s25 = inlined_call_operand.vmem [shape: f32[8,64], index: 25, kind: input, shape index: {}]   ;;  %s646_s26 = inlined_call_operand.vmem [shape: f32[8,64], index: 26, kind: input, shape index: {}]   ;;  %s647_s27 = inlined_call_operand.vmem [shape: f32[6], index: 27, kind: output, shape index: {}]  }
   0x1   :  { %648 = sst [smem:[#allocation5_spill]] %s620_s0 }
   0x2   :  { %649 = sst [smem:[#allocation6_spill]] %s621_s1 }
   0x3   :  { %650 = sst [smem:[#allocation7_spill]] %s622_s2 }
   0x4   :  { %651 = sst [smem:[#allocation8_spill]] %s623_s3 }
   0x5   :  { %652 = sst [smem:[#allocation9_spill]] %s624_s4 }
   0x6   :  { %653 = sst [smem:[#allocation10_spill]] %s625_s5 }
   0x7   :  { %654 = sst [smem:[#allocation11_spill]] %s626_s6 }
   0x8   :  { %655 = sst [smem:[#allocation12_spill]] %s627_s7 }
   0x9   :  { %656 = sst [smem:[#allocation13_spill]] %s628_s8 }
   0xa   :  { %657 = sst [smem:[#allocation14_spill]] %s629_s9 }
   0xb   :  { %658 = sst [smem:[#allocation15_spill]] %s630_s10 }
   0xc   :  { %659 = sst [smem:[#allocation16_spill]] %s631_s11 }
   0xd   :  { %660 = sst [smem:[#allocation17_spill]] %s640_s20 }
   0xe   :  { %s661_s8 = sld [smem:[#allocation9_spill]]  ;;  %s662_s20 = sld [smem:[#allocation5_spill]]  ;;  %v363_v2 = vmov 0   ;;  %v203_v4 = vld [vmem:[%s632_s12] sm:$0xff] }
   0xf   :  { %328 = vset.pattern.permute.xlu1 %v363_v2  ;;  %327 = vset.pattern.permute.xlu0 %v363_v2  ;;  %s663_s0 = sld [smem:[#allocation12_spill]] }
  0x14   :  { %v129_v0 = vld [vmem:[%s661_s8] sm:$0xff] }
  0x15   :  { %v104_v1 = vld [vmem:[%s662_s20] sm:$0xff]  ;;  %131 = vperm.xlu1 %328, %v129_v0  }
  0x16   :  { %106 = vperm.xlu0 %327, %v104_v1   ;;  %v166_v3 = vld [vmem:[%s663_s0] sm:$0xff] }
  0x19   :  { %168 = vperm.xlu1 %328, %v166_v3  }
  0x1a   :  { %32 = vsyncpa [#allocation3], 0  ;;  %v239_v5 = vld [vmem:[%s637_s17] sm:$0xff]  ;;  %s664_s7 = sld [smem:[#allocation14_spill]]  ;;  %s665_s30 = sld [smem:[#allocation16_spill]]  ;;  %v102_v2 = vlaneseq  ;;  %vm135_vm0 = vcmask 15360  }
  0x1b   :  { %v276_v6 = vld [vmem:[%s642_s22] sm:$0xff]  ;;  %s666_s5 = sld [smem:[#allocation11_spill]]  ;;  %s667_s1 = sld [smem:[#allocation7_spill]]  ;;  %vm172_vm3 = vcmask 261120   ;;  %vm245_vm6 = vcmask 523264  }
  0x1c   :  { %v535_v12 = vld [vmem:[%s634_s14] sm:$0xff]  ;;  %s668_s3 = sld [smem:[#allocation13_spill]]  ;;  %s669_s4 = sld [smem:[#allocation15_spill]] }
  0x1d   :  { %205 = vperm.xlu1 %328, %v203_v4   ;;  %v540_v13 = vld [vmem:[%s636_s16] sm:$0xff]  ;;  %s670_s22 = sld [smem:[#allocation6_spill]]  ;;  %s671_s29 = sld [smem:[#allocation8_spill]] }
  0x1e   :  { %v190_v18 = vsub.f32 %v535_v12, %v540_v13  ;;  %v196_v19 = vsub.f32 0.0, %v540_v13  ;;  %v554_v22 = vld [vmem:[%s639_s19] sm:$0xff]  ;;  %s672_s6 = sld [smem:[#allocation17_spill]]  ;;  %v189_v56 = vsub.f32 %v540_v13, %v535_v12  ;;  %s673_s19 = sld [smem:[#allocation10_spill]] }
  0x1f   :  { %v559_v23 = vld [vmem:[%s641_s21] sm:$0xff]  ;;  %s300_s12 = sshll.u32 %s647_s27, 4  ;;  %s301_s12 = int_to_ptr.vmem [resolvable:$true] %s300_s12 }
  0x20   :  { %v149_v7 = vld [vmem:[%s664_s7] sm:$0xff]  ;;  %v191_v24 = vmul.f32 1.442695, %v190_v18  ;;  %v197_v26 = vmul.f32 1.442695, %v196_v19  ;;  %v226_v27 = vsub.f32 %v554_v22, %v559_v23  ;;  %v232_v30 = vsub.f32 0.0, %v559_v23  ;;  %p354_p1 = scmp.lt.s32.totalorder %s301_s12, %s301_s12 }
  0x21   :  { %241 = vperm.xlu1 %328, %v239_v5   ;;  %v151_v8 = vld [vmem:[%s665_s30] sm:$0xff] }
  0x22   :  { %v122_v9 = vld [vmem:[%s666_s5] sm:$0xff]  ;;  %v153_v10 = vsub.f32 %v149_v7, %v151_v8  ;;  %v159_v11 = vsub.f32 0.0, %v151_v8  ;;  %v227_v34 = vmul.f32 1.442695, %v226_v27  ;;  %v233_v36 = vmul.f32 1.442695, %v232_v30 }
  0x23   :  { %v123_v14 = vcvt.s32.f32 %v122_v9  ;;  %v545_v15 = vld [vmem:[%s667_s1] sm:$0xff]  ;;  %v152_v43 = vsub.f32 %v151_v8, %v149_v7  ;;  %s349_s5 = scalar_lea.vmem %s301_s12, 16 }
  0x24   :  { %v154_v16 = vmul.f32 1.442695, %v153_v10  ;;  %v160_v17 = vmul.f32 1.442695, %v159_v11  ;;  %v96_v20 = vmul.f32 -0.5, %v545_v15  ;;  %v148_v25 = vld [vmem:[%s668_s3] sm:$0xff]  ;;  %v225_v11 = vsub.f32 %v559_v23, %v554_v22  ;;  %p350_p0 = scmp.ne.s32.totalorder %s301_s12, %s349_s5  ;;  %p355_p2 = scmp.lt.s32.totalorder %s349_s5, %s349_s5 }
  0x25   :  { %278 = vperm.xlu1 %328, %v276_v6   ;;  %v124_v21 = vadd.f32 1.0, %v123_v14  ;;  %v150_v29 = vld [vmem:[%s669_s4] sm:$0xff]  ;;  %v100_v4 = vmul.f32 0.5, %v545_v15 }
  0x26   :  { %329 = vpow2.f32 %v154_v16  ;;  %v97_v28 = vmul.f32 1.442695, %v96_v20  ;;  %v573_v31 = vld [vmem:[%s644_s24] sm:$0xff]  ;;  %v157_v33 = vsub.f32 %v148_v25, %v150_v29  ;;  %v103_v16 = vand.u32 127, %v102_v2  ;;  %p356_p3 = por %p355_p2, %p354_p1 }
  0x27   :  { %331 = vpow2.f32 %v160_v17  ;;  %v578_v32 = vld [vmem:[%s646_s26] sm:$0xff] }
  0x28   :  { %333 = vlog2.f32 %v124_v21  ;;  %v263_v35 = vsub.f32 %v573_v31, %v578_v32  ;;  %v269_v37 = vsub.f32 0.0, %v578_v32  ;;  %v185_v38 = vld [vmem:[%s633_s13] sm:$0xff]  ;;  %v158_v44 = vmul.f32 %v157_v33, %v157_v33  ;;  %p357_p4 = pnand %p356_p3, %p350_p0 }
  0x29   :  { %335 = vpow2.f32 %v191_v24  ;;  %v187_v39 = vld [vmem:[%s635_s15] sm:$0xff]  ;;  %v262_v18 = vsub.f32 %v578_v32, %v573_v31 }
  0x2a   :  { %337 = vpow2.f32 %v197_v26  ;;  %v91_v40 = vld [vmem:[%s670_s22] sm:$0xff]  ;;  %v264_v45 = vmul.f32 1.442695, %v263_v35  ;;  %v194_v47 = vsub.f32 %v185_v38, %v187_v39  ;;  %v270_v48 = vmul.f32 1.442695, %v269_v37 }
  0x2b   :  { %339 = vpow2.f32 %v97_v28  ;;  %v93_v41 = vld [vmem:[%s671_s29] sm:$0xff] }
  0x2c   :  { %341 = vpow2.f32 %v227_v34  ;;  %v94_v49 = vsub.f32 %v91_v40, %v93_v41  ;;  %v221_v51 = vld [vmem:[%s638_s18] sm:$0xff]  ;;  %v195_v57 = vmul.f32 %v194_v47, %v194_v47 }
  0x2d   :  { %343 = vpow2.f32 %v233_v36  ;;  %v223_v52 = vld [vmem:[%s672_s6] sm:$0xff] }
  0x2e   :  { %345 = vpow2.f32 %v264_v45  ;;  %v95_v59 = vand.u32 2147483647, %v94_v49  ;;  %v230_v61 = vsub.f32 %v221_v51, %v223_v52  ;;  %v258_v62 = vld [vmem:[%s643_s23] sm:$0xff] }
  0x2f   :  { %347 = vpow2.f32 %v270_v48  ;;  %v260_v63 = vld [vmem:[%s645_s25] sm:$0xff] }
  0x30   :  { %v330_v42 = vpop.eup %329  ;;  %v121_v1 = vld [vmem:[%s673_s19] sm:$0xff]  ;;  %v267_v7 = vsub.f32 %v258_v62, %v260_v63  ;;  %v231_v12 = vmul.f32 %v230_v61, %v230_v61 }
  0x31   :  { %v332_v46 = vpop.eup %331  ;;  %v156_v53 = vadd.f32 %v330_v42, %v152_v43 }
  0x32   :  { %v334_v50 = vpop.eup %333  ;;  %v162_v54 = vmul.f32 %v332_v46, %v158_v44  ;;  %v268_v19 = vmul.f32 %v267_v7, %v267_v7 }
  0x33   :  { %v336_v55 = vpop.eup %335  ;;  %v126_v60 = vmul.f32 0.6931472, %v334_v50 }
  0x34   :  { %v338_v58 = vpop.eup %337  ;;  %v163_v3 = vadd.f32 %v162_v54, %v156_v53  ;;  %v193_v5 = vadd.f32 %v336_v55, %v189_v56 }
  0x35   :  { %v340_v0 = vpop.eup %339  ;;  %v199_v6 = vmul.f32 %v338_v58, %v195_v57  ;;  %v127_v10 = vsub.f32 %v121_v1, %v126_v60 }
  0x36   :  { %v342_v8 = vpop.eup %341  ;;  %v99_v9 = vmul.f32 %v340_v0, %v95_v59  ;;  %v309_v14 = vadd.f32 -1.0, %v163_v3 }
  0x37   :  { %v344_v13 = vpop.eup %343  ;;  %v200_v17 = vadd.f32 %v199_v6, %v193_v5  ;;  %v128_v21 = vmul.f32 %v127_v10, %v127_v10  ;;  %v229_v24 = vadd.f32 %v342_v8, %v225_v11 }
  0x38   :  { %v346_v20 = vpop.eup %345  ;;  %v101_v15 = vadd.f32 %v100_v4, %v99_v9  ;;  %v235_v25 = vmul.f32 %v344_v13, %v231_v12  ;;  %v165_v29 = vmul.f32 0.5, %v309_v14 }
  0x39   :  { %v348_v26 = vpop.eup %347  ;;  %v310_v22 = vadd.f32 -1.0, %v200_v17  ;;  %v266_v23 = vadd.f32 %v346_v20, %v262_v18 }
  0x3a   :  { %v236_v34 = vadd.f32 %v235_v25, %v229_v24  ;;  %v272_v35 = vmul.f32 %v348_v26, %v268_v19 }
  0x3b   :  { %v202_v37 = vmul.f32 0.5, %v310_v22 }
  0x3c   :  { %v311_v38 = vadd.f32 -1.0, %v236_v34  ;;  %v273_v39 = vadd.f32 %v272_v35, %v266_v23 }
  0x3e   :  { %v238_v43 = vmul.f32 0.5, %v311_v38  ;;  %v312_v44 = vadd.f32 -1.0, %v273_v39 }
  0x40   :  { %v275_v48 = vmul.f32 0.5, %v312_v44 }
  0x94   :  { %v132_v27 = vpop.permute.xlu1 %131 }
  0x95   :  { %v107_v28 = vpop.permute.xlu0 %106  ;;  %vm133_vm1 = vcmp.lt.s32.totalorder %v103_v16, %v132_v27 }
  0x96   :  { %vm108_vm2 = vcmp.lt.s32.totalorder %v103_v16, %v107_v28  ;;  %v134_v33 = vsel %vm133_vm1, %v128_v21, 0.0 }
  0x97   :  { %v109_v30 = vsel %vm108_vm2, %v101_v15, 0.0  ;;  %v136_v31 = vsel %vm135_vm0, %v134_v33, 0.0 }
  0x98   :  { %110 = vadd.xlane.f32.xlu0 %v109_v30  ;;  %v169_v32 = vpop.permute.xlu1 %168  ;;  %137 = vadd.xlane.f32.xlu1 %v136_v31 }
  0x99   :  { %vm170_vm4 = vcmp.lt.s32.totalorder %v103_v16, %v169_v32 }
  0x9a   :  { %v171_v36 = vsel %vm170_vm4, %v165_v29, 0.0 }
  0x9b   :  { %v173_v40 = vsel %vm172_vm3, %v171_v36, 0.0 }
  0x9c   :  { %v206_v41 = vpop.permute.xlu1 %205  ;;  %174 = vadd.xlane.f32.xlu0 %v173_v40 }
  0x9d   :  { %vm207_vm5 = vcmp.lt.s32.totalorder %v103_v16, %v206_v41 }
  0x9e   :  { %v208_v42 = vsel %vm207_vm5, %v202_v37, 0.0 }
  0x9f   :  { %v209_v45 = vsel %vm172_vm3, %v208_v42, 0.0 }
  0xa0   :  { %v242_v46 = vpop.permute.xlu1 %241  ;;  %210 = vadd.xlane.f32.xlu0 %v209_v45 }
  0xa1   :  { %vm243_vm7 = vcmp.lt.s32.totalorder %v103_v16, %v242_v46 }
  0xa2   :  { %v244_v47 = vsel %vm243_vm7, %v238_v43, 0.0 }
  0xa3   :  { %v246_v49 = vsel %vm245_vm6, %v244_v47, 0.0 }
  0xa4   :  { %v279_v50 = vpop.permute.xlu1 %278  ;;  %247 = vadd.xlane.f32.xlu0 %v246_v49 }
  0xa5   :  { %vm280_vm8 = vcmp.lt.s32.totalorder %v103_v16, %v279_v50 }
  0xa6   :  { %v281_v51 = vsel %vm280_vm8, %v275_v48, 0.0 }
  0xa7   :  { %v282_v52 = vsel %vm245_vm6, %v281_v51, 0.0 }
  0xa8   :  { %283 = vadd.xlane.f32.xlu0 %v282_v52 }
 0x125   :  { %v111_v53 = vpop.xlane.xlu0 %110  ;;  %v138_v55 = vpop.xlane.xlu1 %137 }
 0x126   :  { %v112_v54 = vrot.slane %v111_v53, 4  ;;  %v139_v56 = vrot.slane %v138_v55, 4 }
 0x128   :  { %v113_v57 = vadd.f32 %v112_v54, %v111_v53  ;;  %v140_v58 = vadd.f32 %v139_v56, %v138_v55 }
 0x129   :  { %v175_v60 = vpop.xlane.xlu0 %174 }
 0x12a   :  { %v114_v59 = vrot.slane %v113_v57, 2  ;;  %v141_v61 = vrot.slane %v140_v58, 2  ;;  %v176_v62 = vrot.slane %v175_v60, 4 }
 0x12c   :  { %v115_v63 = vadd.f32 %v114_v59, %v113_v57  ;;  %v142_v0 = vadd.f32 %v141_v61, %v140_v58  ;;  %v177_v1 = vadd.f32 %v176_v62, %v175_v60 }
 0x12d   :  { %v211_v2 = vpop.xlane.xlu0 %210 }
 0x12e   :  { %v116_v3 = vrot.slane %v115_v63, 1  ;;  %v178_v4 = vrot.slane %v177_v1, 2  ;;  %v212_v5 = vrot.slane %v211_v2, 4  ;;  %v143_v6 = vrot.slane %v142_v0, 1 }
 0x130   :  { %v117_v7 = vadd.f32 %v116_v3, %v115_v63  ;;  %v213_v8 = vadd.f32 %v212_v5, %v211_v2  ;;  %v144_v9 = vadd.f32 %v143_v6, %v142_v0  ;;  %v179_v10 = vadd.f32 %v178_v4, %v177_v1 }
 0x131   :  { %v248_v11 = vpop.xlane.xlu0 %247 }
 0x132   :  { %313 = vpush %v117_v7  ;;  %v214_v12 = vrot.slane %v213_v8, 2  ;;  %v249_v13 = vrot.slane %v248_v11, 4  ;;  %v180_v14 = vrot.slane %v179_v10, 1 }
 0x133   :  { %315 = vpush %v144_v9 }
 0x134   :  { %v250_v16 = vadd.f32 %v249_v13, %v248_v11  ;;  %v181_v17 = vadd.f32 %v180_v14, %v179_v10  ;;  %v215_v18 = vadd.f32 %v214_v12, %v213_v8 }
 0x135   :  { %v284_v19 = vpop.xlane.xlu0 %283 }
 0x136   :  { %v251_v20 = vrot.slane %v250_v16, 2  ;;  %v285_v15 = vrot.slane %v284_v19, 4  ;;  %317 = vpush %v181_v17  ;;  %v216_v21 = vrot.slane %v215_v18, 1 }
 0x138   :  { %v286_v24 = vadd.f32 %v285_v15, %v284_v19  ;;  %v217_v25 = vadd.f32 %v216_v21, %v215_v18  ;;  %v252_v26 = vadd.f32 %v251_v20, %v250_v16 }
 0x13a   :  { %v287_v27 = vrot.slane %v286_v24, 2  ;;  %319 = vpush %v217_v25  ;;  %v253_v28 = vrot.slane %v252_v26, 1 }
 0x13c   :  { %v288_v29 = vadd.f32 %v287_v27, %v286_v24  ;;  %v254_v22 = vadd.f32 %v253_v28, %v252_v26 }
 0x13e   :  { %321 = vpush %v254_v22  ;;  %v289_v23 = vrot.slane %v288_v29, 1 }
 0x140   :  { %v290_v30 = vadd.f32 %v289_v23, %v288_v29 }
 0x142   :  { %323 = vpush %v290_v30 }
 0x163   :  { %s314_s23 = spop %313 }
 0x164   :  { %120 = sst [smem:[#allocation2]] %s314_s23  ;;  %s316_s25 = spop %315 }
 0x165   :  { %147 = sst [smem:[#allocation2 + $0x1]] %s316_s25 }
 0x167   :  { %s318_s7 = spop %317 }
 0x168   :  { %184 = sst [smem:[#allocation2 + $0x2]] %s318_s7 }
 0x16b   :  { %s320_s4 = spop %319 }
 0x16c   :  { %220 = sst [smem:[#allocation2 + $0x3]] %s320_s4 }
 0x16f   :  { %s322_s21 = spop %321 }
 0x170   :  { %257 = sst [smem:[#allocation2 + $0x4]] %s322_s21 }
 0x173   :  { %s324_s9 = spop %323 }
 0x174   :  { %293 = sst [smem:[#allocation2 + $0x5]] %s324_s9 }
 0x175   :  { %360 = shalt.err (!%p357_p4)
}
 0x176   :  { %s364_s24 = smov [#allocation2]  }
 0x177   :  { %303 = dma.smem_to_vmem %s364_s24, 16, %s301_s12, [#allocation3]  }
 0x178   :  { %361 = dma.done.wait [#allocation3], 16  }
 0x179   :  { %362 = vsyncadd [#allocation3], 4294967280 }
 0x17a   :  { %307 = sfence }
 0x17b   :  { %308 = vsyncpa [#allocation3], 1 }

</bundles_post_ra>
